<compile_context>
chip_gen: v5e
topology: v5e:2x2
jax: 0.10.0
libtpu: 0.0.40
codegen_flags: <defaults>
</compile_context>

<pallas_src>
import math
from typing import Optional

import jax
import jax.numpy as jnp
from jax.experimental import pallas as pl
from jax.experimental.pallas import tpu as pltpu


def _round_up(x: int, m: int) -> int:
    return ((x + m - 1) // m) * m


def _sublane_multiple(dtype) -> int:
    itemsize = jnp.dtype(dtype).itemsize
    if itemsize >= 4:
        return 8
    if itemsize == 2:
        return 16
    return 32


def _vmem_capacity_bytes() -> int:
    """Best-effort query of per-core VMEM; conservative fallback (v7x = 64 MiB)."""
    try:
        info = pltpu.get_tpu_info()
        cap = getattr(info, "vmem_capacity_bytes", None)
        if cap:
            return int(cap)
    except Exception:
        pass
    return 64 * 1024 * 1024


# ---------------------------------------------------------------------------
# Kernels: x_ref (tm, tk) @ w_ref (tk, tn) -> o_ref (tm, tn), K grid axis last.
# ---------------------------------------------------------------------------

def _unembed_kernel_f32out(x_ref, w_ref, o_ref):
    # f32 output: accumulate straight into the (K-resident) output block.
    @pl.when(pl.program_id(2) == 0)
    def _init():
        o_ref[...] = jnp.zeros_like(o_ref)

    o_ref[...] += jnp.dot(x_ref[...], w_ref[...],
                          preferred_element_type=jnp.float32)


def _unembed_kernel_scratch(x_ref, w_ref, o_ref, acc_ref):
    # Non-f32 output: accumulate in an f32 VMEM scratch, cast on the last K step.
    @pl.when(pl.program_id(2) == 0)
    def _init():
        acc_ref[...] = jnp.zeros_like(acc_ref)

    acc_ref[...] += jnp.dot(x_ref[...], w_ref[...],
                            preferred_element_type=jnp.float32)

    @pl.when(pl.program_id(2) == pl.num_programs(2) - 1)
    def _finalize():
        o_ref[...] = acc_ref[...].astype(o_ref.dtype)


# ---------------------------------------------------------------------------
# Weight prep (batch-invariant; hoist / cache this across calls in real use).
# ---------------------------------------------------------------------------

def prepare_unembed_weight(unembed: jax.Array, *, tn: int, tk: int,
                           compute_dtype) -> jax.Array:
    """(p, p, model_dim) -> padded (k_pad, n_pad) matrix, MXU-native (K, N)."""
    p, p2, model_dim = unembed.shape
    assert p == p2
    pp = p * p
    n_pad = _round_up(pp, tn)
    k_pad = _round_up(model_dim, tk)
    w = unembed.reshape(pp, model_dim).astype(compute_dtype).T   # (K, N), once
    if (k_pad, n_pad) != (model_dim, pp):
        w = jnp.pad(w, ((0, k_pad - model_dim), (0, n_pad - pp)))
    return w


# ---------------------------------------------------------------------------
# Public wrapper.
# ---------------------------------------------------------------------------

def polynomial_unembed(x: jax.Array, unembed: jax.Array,
                       compute_dtype: Optional[jnp.dtype] = None) -> jax.Array:
    """Pallas equivalent of PolynomialUnembed.forward.

    Args:
        x:             (batch, model_dim)
        unembed:       (p, p, model_dim)
        compute_dtype: optional MXU operand dtype (e.g. jnp.bfloat16);
                       accumulation is always f32, output keeps x.dtype.
    Returns:
        (batch, p, p)
    """
    batch, model_dim = x.shape
    p = unembed.shape[0]
    assert unembed.shape == (p, p, model_dim)
    pp = p * p

    out_dtype = x.dtype
    compute_dtype = jnp.dtype(compute_dtype) if compute_dtype is not None \
        else jnp.dtype(x.dtype)

    # --- Tile sizes ------------------------------------------------------
    # Sublane-align tm to the compute dtype's packed vreg tiling; tn/tk are
    # lane/MXU aligned (multiples of 128).  Caps chosen so the double-buffered
    # footprint (~18 MiB f32, ~9 MiB bf16) sits well under 64 MiB (v7x) and
    # leaves headroom on 128 MiB (v5e/v6e) while keeping grid steps few.
    sub = max(_sublane_multiple(compute_dtype), _sublane_multiple(out_dtype))
    tm = min(512, _round_up(batch, sub))
    tn = min(1024, _round_up(pp, 128))
    tk = min(1024, _round_up(model_dim, 128))

    m_pad = _round_up(batch, tm)
    n_pad = _round_up(pp, tn)
    k_pad = _round_up(model_dim, tk)

    # Batch-invariant weight prep (reshape/transpose/cast/pad). In a training /
    # serving loop, call prepare_unembed_weight once and reuse the result.
    w_p = prepare_unembed_weight(unembed, tn=tn, tk=tk,
                                 compute_dtype=compute_dtype)  # (k_pad, n_pad)

    x_p = x.astype(compute_dtype)
    if (m_pad, k_pad) != (batch, model_dim):
        # K zero-padding contributes 0 to the contraction; padded M rows and N
        # columns are sliced off below (keeps the output tile lane-dense).
        x_p = jnp.pad(x_p, ((0, m_pad - batch), (0, k_pad - model_dim)))

    m_tiles, n_tiles, k_tiles = m_pad // tm, n_pad // tn, k_pad // tk
    grid = (m_tiles, n_tiles, k_tiles)

    use_scratch = jnp.dtype(out_dtype) != jnp.float32
    kernel = _unembed_kernel_scratch if use_scratch else _unembed_kernel_f32out
    scratch_shapes = [pltpu.VMEM((tm, tn), jnp.float32)] if use_scratch else []

    in_itemsize = jnp.dtype(compute_dtype).itemsize
    out_itemsize = jnp.dtype(out_dtype).itemsize

    # Double-buffered inputs + double-buffered output (+ optional f32 scratch).
    tile_bytes = (2 * (tm * tk + tk * tn) * in_itemsize
                  + 2 * tm * tn * out_itemsize
                  + (tm * tn * 4 if use_scratch else 0))
    vmem_cap = _vmem_capacity_bytes()
    vmem_limit = int(min(max(tile_bytes + (4 << 20), 32 << 20),
                         int(0.85 * vmem_cap)))

    # bytes_accessed counts operand re-reads across the grid: x is streamed once
    # per N tile, W once per M tile, output written once.
    cost = pl.CostEstimate(
        flops=2 * m_pad * n_pad * k_pad,
        transcendentals=0,
        bytes_accessed=(m_pad * k_pad * in_itemsize * n_tiles
                        + k_pad * n_pad * in_itemsize * m_tiles
                        + m_pad * n_pad * out_itemsize),
    )

    out_padded = pl.pallas_call(
        kernel,
        out_shape=jax.ShapeDtypeStruct((m_pad, n_pad), out_dtype),
        grid_spec=pltpu.PrefetchScalarGridSpec(
            num_scalar_prefetch=0,
            grid=grid,
            in_specs=[
                pl.BlockSpec((tm, tk), lambda i, j, k: (i, k)),
                # W tile depends only on (j, k): batch-invariant weight reuse.
                pl.BlockSpec((tk, tn), lambda i, j, k: (k, j)),
            ],
            out_specs=pl.BlockSpec((tm, tn), lambda i, j, k: (i, j)),
            scratch_shapes=scratch_shapes,
        ),
        compiler_params=pltpu.CompilerParams(
            # TODO(synk): on v7x, consider CORE_PARALLEL on the j axis (or a
            # core_map split) so each TensorCore streams half of W.
            dimension_semantics=("parallel", "parallel", "arbitrary"),
            vmem_limit_bytes=vmem_limit,
        ),
        cost_estimate=cost,
    )(x_p, w_p)

    out = out_padded[:batch, :pp]
    return out.reshape(batch, p, p)


def polynomial_unembed_auto(x: jax.Array, unembed: jax.Array) -> jax.Array:
    """Size-aware dispatch: tiny problems go straight to XLA (Pallas per-step
    overhead dominates there); larger ones use the Pallas kernel (bf16 MXU
    operands with f32 accumulation on real model shapes)."""
    batch, model_dim = x.shape
    p = unembed.shape[0]
    if batch * p * p * model_dim < (1 << 20):
        return jnp.einsum("ijk,bk->bij", unembed, x)
    return polynomial_unembed(x, unembed, compute_dtype=jnp.bfloat16)


def reference(x, unembed):
    # out[b, i, j] = sum_k unembed[i, j, k] * x[b, k]
    return jnp.einsum("ijk,bk->bij", unembed, x)


if __name__ == "__main__":
    p = 5
    model_dim = 32
    batch = 2

    key = jax.random.PRNGKey(0)
    k_w, k_x = jax.random.split(key)

    std = math.sqrt(2.0 / model_dim)
    unembed = jax.random.normal(k_w, (p, p, model_dim), dtype=jnp.float32) * std
    x = jax.random.normal(k_x, (batch, model_dim), dtype=jnp.float32)

    # Exercise the Pallas kernel directly in f32 (the _auto wrapper would send
    # these tiny demo shapes to plain XLA, and bf16 would loosen tolerances).
    out = polynomial_unembed(x, unembed)
    out = jax.block_until_ready(out)

    ref = reference(x, unembed)
    assert out.shape == (batch, p, p)
    assert jnp.allclose(out, ref, atol=1e-5, rtol=1e-5)

    print("KERNEL_OK")
</pallas_src>

<mosaic_0001>
module attributes {stable_mosaic.version = 11 : i64} {
  func.func @_unembed_kernel_f32out(%arg0: i32, %arg1: i32, %arg2: i32, %arg3: memref<8x128xf32, #tpu.memory_space<vmem>>, %arg4: memref<128x128xf32, #tpu.memory_space<vmem>>, %arg5: memref<8x128xf32, #tpu.memory_space<vmem>>) attributes {dimension_semantics = [#tpu.dimension_semantics<parallel>, #tpu.dimension_semantics<parallel>, #tpu.dimension_semantics<arbitrary>], iteration_bounds = array<i64: 1, 1, 1>, scalar_prefetch = 0 : i64, scratch_operands = 0 : i64, tpu.core_type = #tpu.core_type<tc>, window_params = [{transform_indices = @transform_0, window_bounds = array<i64: 8, 128>}, {transform_indices = @transform_1, window_bounds = array<i64: 128, 128>}, {transform_indices = @transform_2, window_bounds = array<i64: 8, 128>}]} {
    %c0_i32 = arith.constant 0 : i32
    %0 = arith.cmpi eq, %arg2, %c0_i32 : i32
    %1 = arith.extui %0 : i1 to i32
    %c0_i32_0 = arith.constant 0 : i32
    %2 = arith.cmpi ne, %1, %c0_i32_0 : i32
    scf.if %2 {
      %cst_8 = arith.constant 0.000000e+00 : f32
      %9 = vector.broadcast %cst_8 : f32 to vector<8x128xf32>
      %c0_9 = arith.constant 0 : index
      %c0_10 = arith.constant 0 : index
      %10 = vector.load %arg5[%c0_9, %c0_10] : memref<8x128xf32, #tpu.memory_space<vmem>>, vector<8x128xf32>
      tpu.vector_store %arg5[%c0_9, %c0_10], %9 {strides = array<i32>} : memref<8x128xf32, #tpu.memory_space<vmem>>, vector<8x128xf32>,
    } else {
    }
    %c0 = arith.constant 0 : index
    %c0_1 = arith.constant 0 : index
    %3 = vector.load %arg5[%c0, %c0_1] : memref<8x128xf32, #tpu.memory_space<vmem>>, vector<8x128xf32>
    %c0_2 = arith.constant 0 : index
    %c0_3 = arith.constant 0 : index
    %4 = vector.load %arg3[%c0_2, %c0_3] : memref<8x128xf32, #tpu.memory_space<vmem>>, vector<8x128xf32>
    %c0_4 = arith.constant 0 : index
    %c0_5 = arith.constant 0 : index
    %5 = vector.load %arg4[%c0_4, %c0_5] : memref<128x128xf32, #tpu.memory_space<vmem>>, vector<128x128xf32>
    %cst = arith.constant dense<0.000000e+00> : vector<8x128xf32>
    %6 = tpu.matmul %4, %5, %cst {dimension_numbers = #tpu.dot_dimension_numbers<[1], [0], [0], [1], [0, 0, 1, 1], [], []>} : vector<8x128xf32>, vector<128x128xf32>, vector<8x128xf32> -> vector<8x128xf32>
    %7 = arith.addf %3, %6 : vector<8x128xf32>
    %c0_6 = arith.constant 0 : index
    %c0_7 = arith.constant 0 : index
    %8 = vector.load %arg5[%c0_6, %c0_7] : memref<8x128xf32, #tpu.memory_space<vmem>>, vector<8x128xf32>
    tpu.vector_store %arg5[%c0_6, %c0_7], %7 {strides = array<i32>} : memref<8x128xf32, #tpu.memory_space<vmem>>, vector<8x128xf32>,
    return
  }
  func.func @transform_0(%arg0: i32, %arg1: i32, %arg2: i32) -> (i32, i32) {
    %c0_i32 = arith.constant 0 : i32
    return %arg0, %arg2 : i32, i32
  }
  func.func @transform_1(%arg0: i32, %arg1: i32, %arg2: i32) -> (i32, i32) {
    %c0_i32 = arith.constant 0 : i32
    return %arg2, %arg1 : i32, i32
  }
  func.func @transform_2(%arg0: i32, %arg1: i32, %arg2: i32) -> (i32, i32) {
    %c0_i32 = arith.constant 0 : i32
    return %arg0, %arg1 : i32, i32
  }
}

</mosaic_0001>

<bundles_post_ra>
// kernel: tpu_custom_call.1
= control target key start
LH: loop header
LB: loop body
LE: loop exit
PB: predicated region body
PF: predicated region fallthrough
CT: control target
= control target key end

     0   :  { %7 = vsyncpa [#allocation3], 0  ;;  %s218_s0 = inlined_call_operand.hbm [shape: f32[8,128], index: 0, kind: input, shape index: {}]   ;;  %s219_s1 = inlined_call_operand.hbm [shape: f32[128,128], index: 1, kind: input, shape index: {}]   ;;  %s220_s2 = inlined_call_operand.hbm [shape: f32[8,128], index: 2, kind: output, shape index: {}]  }
   0x1   :  { %8 = vsyncpa [#allocation6], 0 }
   0x2   :  { %9 = vsyncpa [#allocation4], 0  ;;  %s15_s11 = sshll.u32 %s218_s0, 4  ;;  %s189_s12 = smov [#allocation2]   ;;  %s16_s11 = int_to_ptr.hbm [resolvable:$true] %s15_s11 }
   0x3   :  { %s17_s13 = sshll.u32 %s189_s12, 4  ;;  %s25_s16 = sshll.u32 %s219_s1, 4  ;;  %s18_s13 = int_to_ptr.vmem [resolvable:$true] %s17_s13  ;;  %s26_s16 = int_to_ptr.hbm [resolvable:$true] %s25_s16 }
   0x4   :  { %20 = dma.hbm_to_vmem [thread:$0]  %s16_s11, 128, %s18_s13, [#allocation3]  }
   0x5   :  { %s190_s17 = smov [#allocation5]   ;;  %s191_s19 = smov 128  }
   0x6   :  { %s27_s18 = sshll.u32 %s190_s17, 4  ;;  %s192_s20 = smov 8   ;;  %s28_s18 = int_to_ptr.vmem [resolvable:$true] %s27_s18 }
   0x7   :  { %33 = dma.hbm_to_vmem [thread:$0]  %s26_s16, 2048, %s28_s18, [#allocation6], %s191_s19, %s191_s19, %s192_s20  }
   0x8   :  { %183 = dma.done.wait [#allocation3], 128  }
   0x9   :  { %184 = vsyncadd [#allocation3], 4294967168 }
   0xa   :  { %185 = dma.done.wait [#allocation6], 2048  }
   0xb   :  { %186 = vsyncadd [#allocation6], 4294965248  ;;  %v64_v0 = vld [vmem:[#allocation5 + $0x78] sm:$0xff]  ;;  %v63_v1 = vld [vmem:[#allocation5 + $0x70] sm:$0xff]  ;;  %s193_s0 = smov [#allocation7]   ;;  %s94_s23 = sshll.u32 %s220_s2, 4  ;;  %s95_s23 = int_to_ptr.hbm [resolvable:$true] %s94_s23 }
   0xc   :  { %65 = vmatpush.msra.mxu0 %v64_v0  ;;  %v62_v2 = vld [vmem:[#allocation5 + $0x68] sm:$0xff]  ;;  %v61_v3 = vld [vmem:[#allocation5 + $0x60] sm:$0xff]  ;;  %v60_v4 = vld [vmem:[#allocation5 + $0x58] sm:$0xff]  ;;  %s92_s1 = sshll.u32 %s193_s0, 4  ;;  %s93_s1 = int_to_ptr.vmem [resolvable:$true] %s92_s1 }
   0xd   :  { %v59_v5 = vld [vmem:[#allocation5 + $0x50] sm:$0xff]  ;;  %v58_v6 = vld [vmem:[#allocation5 + $0x48] sm:$0xff]  ;;  %v57_v7 = vld [vmem:[#allocation5 + $0x40] sm:$0xff] }
   0xe   :  { %66 = vmatpush.msra.mxu0 %v63_v1  ;;  %v56_v8 = vld [vmem:[#allocation5 + $0x38] sm:$0xff]  ;;  %v55_v9 = vld [vmem:[#allocation5 + $0x30] sm:$0xff]  ;;  %v54_v10 = vld [vmem:[#allocation5 + $0x28] sm:$0xff] }
   0xf   :  { %v53_v11 = vld [vmem:[#allocation5 + $0x20] sm:$0xff]  ;;  %v52_v12 = vld [vmem:[#allocation5 + $0x18] sm:$0xff]  ;;  %v51_v13 = vld [vmem:[#allocation5 + $0x10] sm:$0xff] }
  0x10   :  { %67 = vmatpush.msra.mxu0 %v62_v2  ;;  %v50_v14 = vld [vmem:[#allocation5 + $0x8] sm:$0xff]  ;;  %v49_v15 = vld [vmem:[#allocation5] sm:$0xff]  ;;  %v48_v16 = vld [vmem:[#allocation2] sm:$0xff] }
  0x12   :  { %68 = vmatpush.msra.mxu0 %v61_v3 }
  0x14   :  { %69 = vmatpush.msra.mxu0 %v60_v4 }
  0x16   :  { %70 = vmatpush.msra.mxu0 %v59_v5 }
  0x18   :  { %71 = vmatpush.msra.mxu0 %v58_v6 }
  0x1a   :  { %72 = vmatpush.msra.mxu0 %v57_v7 }
  0x1c   :  { %73 = vmatpush.msra.mxu0 %v56_v8 }
  0x1e   :  { %74 = vmatpush.msra.mxu0 %v55_v9 }
  0x20   :  { %75 = vmatpush.msra.mxu0 %v54_v10 }
  0x22   :  { %76 = vmatpush.msra.mxu0 %v53_v11 }
  0x24   :  { %77 = vmatpush.msra.mxu0 %v52_v12 }
  0x26   :  { %78 = vmatpush.msra.mxu0 %v51_v13 }
  0x28   :  { %79 = vmatpush.msra.mxu0 %v50_v14 }
  0x2a   :  { %80 = vmatpush.msra.mxu0 %v49_v15 }
  0x2b   :  { %81 = vmatmul.f32.vlgmr.msra.gmra.mxu0 %v48_v16 }
  0xa8   :  { %v82_v17 = vpop.f32.mrf.mxu0 }
  0xa9   :  { %86 = vst [vmem:[#allocation7] sm:$0xff] %v82_v17 }
  0xaa   :  { %97 = dma.vmem_to_hbm [thread:$0]  %s93_s1, 128, %s95_s23, [#allocation4]  }
  0xab   :  { %187 = dma.done.wait [#allocation4], 128  }
  0xac   :  { %188 = vsyncadd [#allocation4], 4294967168 }
  0xad   :  { %102 = vsyncpa [#allocation3], 1 }
  0xae   :  { %103 = vsyncpa [#allocation6], 1 }
  0xaf   :  { %104 = vsyncpa [#allocation4], 1 }

</bundles_post_ra>
